<compile_context>
chip_gen: v7x
topology: tpu7x:2x2x1
jax: 0.10.0
libtpu: 0.0.40
codegen_flags: <defaults>
</compile_context>

<pallas_src>
import jax
import jax.numpy as jnp
from jax.experimental import pallas as pl
from jax.experimental.pallas import tpu as pltpu


def _round_up(x, m):
    return ((x + m - 1) // m) * m


def _cdiv(a, b):
    return (a + b - 1) // b


def _make_mlp_kernel(num_layers, output_activation, output_scale,
                     compute_dtype, pack):
    """Fused MLP kernel.

    Ref order: (x, w0, b0, ..., w_{L-1}, b_{L-1}, out[, pack_scratch]).
    Weights arrive pre-transposed to [in, out]; biases as [1, out].
    When pack > 1 the output block is a lane-dense slab of shape
    (tile_rows // pack, pack * out_dim), holding `pack` consecutive batch rows
    per 128-lane row (row-major compatible with a plain wrapper reshape).
    """

    def kernel(*refs):
        x_ref = refs[0]
        wb = refs[1:1 + 2 * num_layers]
        out_ref = refs[1 + 2 * num_layers]

        x = x_ref[...].astype(compute_dtype)
        for i in range(num_layers):
            w = wb[2 * i][...]                               # [in, out]
            b = wb[2 * i + 1][...].astype(compute_dtype)     # [1, out]
            # MXU matmul with f32 accumulation regardless of storage dtype.
            y = jnp.dot(x.astype(w.dtype), w,
                        preferred_element_type=jnp.float32)
            y = y.astype(compute_dtype) + b
            if i < num_layers - 1:
                x = jnp.tanh(y)                 # hidden activation (EUP/VPU)
            else:
                if output_activation is not None:
                    y = output_activation(y)
                x = y * output_scale if output_scale != 1.0 else y

        if pack == 1:
            out_ref[...] = x.astype(out_ref.dtype)
        else:
            # Lane-dense packing: interleave `pack` batch rows per 128-lane
            # output row so the store is unmasked and the writeback block is
            # lane-dense.  The XLU/strided-load work here is free filler (the
            # XLU slot is otherwise idle in this kernel).
            y_scr = refs[2 + 2 * num_layers]    # VMEM (tile_rows, out_dim) f32
            y_scr[...] = x.astype(y_scr.dtype)
            slab_rows = y_scr.shape[0] // pack
            odim = y_scr.shape[1]
            for g in range(pack):
                out_ref[:, g * odim:(g + 1) * odim] = (
                    y_scr[pl.ds(g, slab_rows, stride=pack), :]
                    .astype(out_ref.dtype))

    return kernel


def prepare_mlp_params(weights, biases, weight_dtype=None):
    """One-time host-side prep (hoisted out of the forward pass).

    weights: list of [out, in] arrays (PyTorch nn.Linear layout)
    biases:  list of [out] arrays
    Returns ([in, out] weights (optionally cast, e.g. bf16), [1, out] biases).
    """
    wts, bss = [], []
    for w, b in zip(weights, biases):
        wt = jnp.asarray(w).T
        if weight_dtype is not None:
            wt = wt.astype(weight_dtype)
        wts.append(wt)
        bss.append(jnp.asarray(b, jnp.float32).reshape(1, -1))
    return wts, bss


def mlp_forward(x, params, *, output_activation=None, output_scale=1.0,
                output_squeeze=False, compute_dtype=jnp.float32,
                tile_b=1024, pack_output=True):
    """Fused Pallas MLP forward.

    x:      [batch, in_features]
    params: output of prepare_mlp_params() (weights already [in, out]).
    compute_dtype: dtype of the activation chain (bf16 recommended on v6e/v7x
                   when weights are stored bf16; keep f32 on v5e).
    """
    weights, biases = params
    num_layers = len(weights)
    batch, in_dim = x.shape
    out_dim = weights[-1].shape[1]
    out_dtype = x.dtype

    # Lane-dense output packing factor (rows of the batch folded into lanes).
    pack = 1
    if pack_output and 8 <= out_dim < 128 and 128 % out_dim == 0:
        pack = 128 // out_dim

    tile_align = 8 * pack if pack > 1 else 8
    single_align = pack if pack > 1 else 1

    pb_min = _round_up(batch, single_align)
    if pb_min <= 2 * tile_align:
        # Tiny batch: single grid step; blocks cover the whole (padded) arrays.
        tb = pb_min
        padded_batch = pb_min
    else:
        # Always >= 2 grid steps so the "parallel" axis can split across the
        # two v7x TensorCores; cap the tile at tile_b for large batches.
        n_steps = max(2, _cdiv(pb_min, tile_b))
        tb = _round_up(_cdiv(pb_min, n_steps), tile_align)
        tb = min(tb, _round_up(tile_b, tile_align))
        padded_batch = _round_up(pb_min, tb)
    grid = (padded_batch // tb,)

    if padded_batch != batch:
        # TODO(synk): for very large ragged batches, mask the tail tile inside
        # the kernel instead of materializing a padded copy of x in HBM.
        x_in = jnp.pad(x, ((0, padded_batch - batch), (0, 0)))
    else:
        x_in = x

    operands = [x_in]
    in_specs = [pl.BlockSpec((tb, in_dim), lambda i: (i, 0))]
    for w, b in zip(weights, biases):
        operands += [w, b]
        # Constant index maps: weights/biases DMA'd once, VMEM-resident.
        in_specs += [pl.BlockSpec(w.shape, lambda i: (0, 0)),
                     pl.BlockSpec(b.shape, lambda i: (0, 0))]

    if pack > 1:
        out_arr_shape = (padded_batch // pack, pack * out_dim)   # lane-dense slab
        out_specs = pl.BlockSpec((tb // pack, pack * out_dim), lambda i: (i, 0))
        scratch_shapes = [pltpu.VMEM((tb, out_dim), jnp.float32)]
    else:
        out_arr_shape = (padded_batch, out_dim)
        out_specs = pl.BlockSpec((tb, out_dim), lambda i: (i, 0))
        scratch_shapes = []

    flops = 2 * padded_batch * sum(w.shape[0] * w.shape[1] for w in weights)
    transcendentals = padded_batch * sum(w.shape[1] for w in weights[:-1])
    bytes_accessed = (
        x_in.size * x_in.dtype.itemsize
        + padded_batch * out_dim * out_dtype.itemsize
        + sum(w.size * w.dtype.itemsize for w in weights)
        + sum(b.size * b.dtype.itemsize for b in biases))

    kernel = _make_mlp_kernel(num_layers, output_activation,
                              float(output_scale), compute_dtype, pack)

    out = pl.pallas_call(
        kernel,
        out_shape=jax.ShapeDtypeStruct(out_arr_shape, out_dtype),
        grid=grid,
        in_specs=in_specs,
        out_specs=out_specs,
        scratch_shapes=scratch_shapes,
        compiler_params=pltpu.CompilerParams(
            dimension_semantics=("parallel",)),
        cost_estimate=pl.CostEstimate(
            flops=flops, transcendentals=transcendentals,
            bytes_accessed=bytes_accessed),
    )(*operands)

    if pack > 1:
        # Free reshape: the slab is a row-major view of (padded_batch, out_dim).
        out = out.reshape(padded_batch, out_dim)
    if padded_batch != batch:
        out = out[:batch]
    if output_squeeze:
        out = jnp.squeeze(out)   # matches PyTorch `.squeeze()` (all size-1 dims)
    return out


def init_mlp_params(key, layer_sizes):
    """Deterministic init mimicking nn.Linear (uniform weights, zero bias)."""
    weights, biases = [], []
    for fan_in, fan_out in zip(layer_sizes[:-1], layer_sizes[1:]):
        key, wkey = jax.random.split(key)
        bound = 1.0 / float(fan_in) ** 0.5
        w = jax.random.uniform(wkey, (fan_out, fan_in), jnp.float32,
                               minval=-bound, maxval=bound)
        b = jnp.zeros((fan_out,), jnp.float32)   # nn.init.zeros_(bias)
        weights.append(w)
        biases.append(b)
    return weights, biases


def _reference(x, weights, biases, output_activation=None, output_scale=1.0):
    h = x
    for i, (w, b) in enumerate(zip(weights, biases)):
        h = h @ w.T + b
        if i < len(weights) - 1:
            h = jnp.tanh(h)
    if output_activation is not None:
        h = output_activation(h)
    return h * output_scale


if __name__ == "__main__":
    key = jax.random.PRNGKey(0)
    key, k1, k2, k3 = jax.random.split(key, 4)

    # layers = [in, hidden, hidden, out] as in MLP([...])
    layer_sizes = [32, 64, 64, 8]
    weights, biases = init_mlp_params(key, layer_sizes)

    # One-time host-side prep (transpose / optional cast) — hoisted out of the
    # forward path per review.
    params_f32 = prepare_mlp_params(weights, biases)
    params_bf16 = prepare_mlp_params(weights, biases, weight_dtype=jnp.bfloat16)

    # 1) Tiny batch, lane-dense packed output, exact f32 path.
    x = jax.random.normal(k1, (8, layer_sizes[0]), jnp.float32)
    y = jax.block_until_ready(mlp_forward(x, params_f32))
    ref = _reference(x, weights, biases)
    assert y.shape == (8, layer_sizes[-1])
    assert jnp.allclose(y, ref, atol=1e-5, rtol=1e-5)

    # 2) bf16 weights + bf16 activation chain (v6e/v7x path), f32 MXU accumulation.
    y_bf = jax.block_until_ready(
        mlp_forward(x, params_bf16, compute_dtype=jnp.bfloat16))
    assert jnp.allclose(y_bf, ref, atol=5e-2, rtol=5e-2)

    # 3) Ragged larger batch → multi-step "parallel" grid, padding, packed output.
    x3 = jax.random.normal(k2, (300, layer_sizes[0]), jnp.float32)
    y3 = jax.block_until_ready(mlp_forward(x3, params_f32, tile_b=128))
    ref3 = _reference(x3, weights, biases)
    assert y3.shape == (300, layer_sizes[-1])
    assert jnp.allclose(y3, ref3, atol=1e-5, rtol=1e-5)

    # 4) Unpacked fallback path + output_activation applied before output_scale.
    x4 = jax.random.normal(k3, (20, layer_sizes[0]), jnp.float32)
    y4 = jax.block_until_ready(
        mlp_forward(x4, params_f32, output_activation=jnp.tanh,
                    output_scale=0.5, pack_output=False))
    ref4 = _reference(x4, weights, biases, output_activation=jnp.tanh,
                      output_scale=0.5)
    assert y4.shape == (20, layer_sizes[-1])
    assert jnp.allclose(y4, ref4, atol=1e-5, rtol=1e-5)

    print("KERNEL_OK")
</pallas_src>

<mosaic_0001>
module attributes {stable_mosaic.version = 11 : i64} {
  func.func @kernel(%arg0: i32, %arg1: memref<16x32xf32, #tpu.memory_space<vmem>>, %arg2: memref<32x64xf32, #tpu.memory_space<vmem>>, %arg3: memref<1x64xf32, #tpu.memory_space<vmem>>, %arg4: memref<64x64xf32, #tpu.memory_space<vmem>>, %arg5: memref<1x64xf32, #tpu.memory_space<vmem>>, %arg6: memref<64x8xf32, #tpu.memory_space<vmem>>, %arg7: memref<1x8xf32, #tpu.memory_space<vmem>>, %arg8: memref<1x128xf32, #tpu.memory_space<vmem>>, %arg9: memref<16x8xf32, #tpu.memory_space<vmem>>) attributes {dimension_semantics = [#tpu.dimension_semantics<parallel>], iteration_bounds = array<i64: 1>, scalar_prefetch = 0 : i64, scratch_operands = 1 : i64, tpu.core_type = #tpu.core_type<tc>, window_params = [{transform_indices = @transform_0, window_bounds = array<i64: 16, 32>}, {pipeline_mode = #tpu.pipeline_mode<synchronous>, transform_indices = @transform_1, window_bounds = array<i64: 32, 64>}, {pipeline_mode = #tpu.pipeline_mode<synchronous>, transform_indices = @transform_2, window_bounds = array<i64: 1, 64>}, {pipeline_mode = #tpu.pipeline_mode<synchronous>, transform_indices = @transform_3, window_bounds = array<i64: 64, 64>}, {pipeline_mode = #tpu.pipeline_mode<synchronous>, transform_indices = @transform_4, window_bounds = array<i64: 1, 64>}, {pipeline_mode = #tpu.pipeline_mode<synchronous>, transform_indices = @transform_5, window_bounds = array<i64: 64, 8>}, {pipeline_mode = #tpu.pipeline_mode<synchronous>, transform_indices = @transform_6, window_bounds = array<i64: 1, 8>}, {transform_indices = @transform_7, window_bounds = array<i64: 1, 128>}]} {
    %c0 = arith.constant 0 : index
    %c0_0 = arith.constant 0 : index
    %0 = vector.load %arg1[%c0, %c0_0] : memref<16x32xf32, #tpu.memory_space<vmem>>, vector<16x32xf32>
    %c0_1 = arith.constant 0 : index
    %c0_2 = arith.constant 0 : index
    %1 = vector.load %arg2[%c0_1, %c0_2] : memref<32x64xf32, #tpu.memory_space<vmem>>, vector<32x64xf32>
    %c0_3 = arith.constant 0 : index
    %c0_4 = arith.constant 0 : index
    %2 = vector.load %arg3[%c0_3, %c0_4] : memref<1x64xf32, #tpu.memory_space<vmem>>, vector<1x64xf32>
    %cst = arith.constant dense<0.000000e+00> : vector<16x64xf32>
    %3 = tpu.matmul %0, %1, %cst {dimension_numbers = #tpu.dot_dimension_numbers<[1], [0], [0], [1], [0, 0, 1, 1], [], []>} : vector<16x32xf32>, vector<32x64xf32>, vector<16x64xf32> -> vector<16x64xf32>
    %4 = vector.broadcast %2 : vector<1x64xf32> to vector<16x64xf32>
    %5 = arith.addf %3, %4 : vector<16x64xf32>
    %6 = math.tanh %5 : vector<16x64xf32>
    %c0_5 = arith.constant 0 : index
    %c0_6 = arith.constant 0 : index
    %7 = vector.load %arg4[%c0_5, %c0_6] : memref<64x64xf32, #tpu.memory_space<vmem>>, vector<64x64xf32>
    %c0_7 = arith.constant 0 : index
    %c0_8 = arith.constant 0 : index
    %8 = vector.load %arg5[%c0_7, %c0_8] : memref<1x64xf32, #tpu.memory_space<vmem>>, vector<1x64xf32>
    %cst_9 = arith.constant dense<0.000000e+00> : vector<16x64xf32>
    %9 = tpu.matmul %6, %7, %cst_9 {dimension_numbers = #tpu.dot_dimension_numbers<[1], [0], [0], [1], [0, 0, 1, 1], [], []>} : vector<16x64xf32>, vector<64x64xf32>, vector<16x64xf32> -> vector<16x64xf32>
    %10 = vector.broadcast %8 : vector<1x64xf32> to vector<16x64xf32>
    %11 = arith.addf %9, %10 : vector<16x64xf32>
    %12 = math.tanh %11 : vector<16x64xf32>
    %c0_10 = arith.constant 0 : index
    %c0_11 = arith.constant 0 : index
    %13 = vector.load %arg6[%c0_10, %c0_11] : memref<64x8xf32, #tpu.memory_space<vmem>>, vector<64x8xf32>
    %c0_12 = arith.constant 0 : index
    %c0_13 = arith.constant 0 : index
    %14 = vector.load %arg7[%c0_12, %c0_13] : memref<1x8xf32, #tpu.memory_space<vmem>>, vector<1x8xf32>
    %cst_14 = arith.constant dense<0.000000e+00> : vector<16x8xf32>
    %15 = tpu.matmul %12, %13, %cst_14 {dimension_numbers = #tpu.dot_dimension_numbers<[1], [0], [0], [1], [0, 0, 1, 1], [], []>} : vector<16x64xf32>, vector<64x8xf32>, vector<16x8xf32> -> vector<16x8xf32>
    %16 = vector.broadcast %14 : vector<1x8xf32> to vector<16x8xf32>
    %17 = arith.addf %15, %16 : vector<16x8xf32>
    %c0_15 = arith.constant 0 : index
    %c0_16 = arith.constant 0 : index
    %18 = vector.load %arg9[%c0_15, %c0_16] : memref<16x8xf32, #tpu.memory_space<vmem>>, vector<16x8xf32>
    tpu.vector_store %arg9[%c0_15, %c0_16], %17 {strides = array<i32>} : memref<16x8xf32, #tpu.memory_space<vmem>>, vector<16x8xf32>,
    %c0_17 = arith.constant 0 : index
    %c0_18 = arith.constant 0 : index
    %19 = tpu.strided_load %arg9[%c0_17, %c0_18] {strides = array<i32: 16, 1>} : memref<16x8xf32, #tpu.memory_space<vmem>>, vector<1x8xf32>
    %c0_19 = arith.constant 0 : index
    %c0_20 = arith.constant 0 : index
    %20 = vector.load %arg8[%c0_19, %c0_20] : memref<1x128xf32, #tpu.memory_space<vmem>>, vector<1x8xf32>
    tpu.vector_store %arg8[%c0_19, %c0_20], %19 {strides = array<i32>} : memref<1x128xf32, #tpu.memory_space<vmem>>, vector<1x8xf32>,
    %c1 = arith.constant 1 : index
    %c0_21 = arith.constant 0 : index
    %21 = tpu.strided_load %arg9[%c1, %c0_21] {strides = array<i32: 16, 1>} : memref<16x8xf32, #tpu.memory_space<vmem>>, vector<1x8xf32>
    %c0_22 = arith.constant 0 : index
    %c8 = arith.constant 8 : index
    %22 = vector.load %arg8[%c0_22, %c8] : memref<1x128xf32, #tpu.memory_space<vmem>>, vector<1x8xf32>
    tpu.vector_store %arg8[%c0_22, %c8], %21 {strides = array<i32>} : memref<1x128xf32, #tpu.memory_space<vmem>>, vector<1x8xf32>,
    %c2 = arith.constant 2 : index
    %c0_23 = arith.constant 0 : index
    %23 = tpu.strided_load %arg9[%c2, %c0_23] {strides = array<i32: 16, 1>} : memref<16x8xf32, #tpu.memory_space<vmem>>, vector<1x8xf32>
    %c0_24 = arith.constant 0 : index
    %c16 = arith.constant 16 : index
    %24 = vector.load %arg8[%c0_24, %c16] : memref<1x128xf32, #tpu.memory_space<vmem>>, vector<1x8xf32>
    tpu.vector_store %arg8[%c0_24, %c16], %23 {strides = array<i32>} : memref<1x128xf32, #tpu.memory_space<vmem>>, vector<1x8xf32>,
    %c3 = arith.constant 3 : index
    %c0_25 = arith.constant 0 : index
    %25 = tpu.strided_load %arg9[%c3, %c0_25] {strides = array<i32: 16, 1>} : memref<16x8xf32, #tpu.memory_space<vmem>>, vector<1x8xf32>
    %c0_26 = arith.constant 0 : index
    %c24 = arith.constant 24 : index
    %26 = vector.load %arg8[%c0_26, %c24] : memref<1x128xf32, #tpu.memory_space<vmem>>, vector<1x8xf32>
    tpu.vector_store %arg8[%c0_26, %c24], %25 {strides = array<i32>} : memref<1x128xf32, #tpu.memory_space<vmem>>, vector<1x8xf32>,
    %c4 = arith.constant 4 : index
    %c0_27 = arith.constant 0 : index
    %27 = tpu.strided_load %arg9[%c4, %c0_27] {strides = array<i32: 16, 1>} : memref<16x8xf32, #tpu.memory_space<vmem>>, vector<1x8xf32>
    %c0_28 = arith.constant 0 : index
    %c32 = arith.constant 32 : index
    %28 = vector.load %arg8[%c0_28, %c32] : memref<1x128xf32, #tpu.memory_space<vmem>>, vector<1x8xf32>
    tpu.vector_store %arg8[%c0_28, %c32], %27 {strides = array<i32>} : memref<1x128xf32, #tpu.memory_space<vmem>>, vector<1x8xf32>,
    %c5 = arith.constant 5 : index
    %c0_29 = arith.constant 0 : index
    %29 = tpu.strided_load %arg9[%c5, %c0_29] {strides = array<i32: 16, 1>} : memref<16x8xf32, #tpu.memory_space<vmem>>, vector<1x8xf32>
    %c0_30 = arith.constant 0 : index
    %c40 = arith.constant 40 : index
    %30 = vector.load %arg8[%c0_30, %c40] : memref<1x128xf32, #tpu.memory_space<vmem>>, vector<1x8xf32>
    tpu.vector_store %arg8[%c0_30, %c40], %29 {strides = array<i32>} : memref<1x128xf32, #tpu.memory_space<vmem>>, vector<1x8xf32>,
    %c6 = arith.constant 6 : index
    %c0_31 = arith.constant 0 : index
    %31 = tpu.strided_load %arg9[%c6, %c0_31] {strides = array<i32: 16, 1>} : memref<16x8xf32, #tpu.memory_space<vmem>>, vector<1x8xf32>
    %c0_32 = arith.constant 0 : index
    %c48 = arith.constant 48 : index
    %32 = vector.load %arg8[%c0_32, %c48] : memref<1x128xf32, #tpu.memory_space<vmem>>, vector<1x8xf32>
    tpu.vector_store %arg8[%c0_32, %c48], %31 {strides = array<i32>} : memref<1x128xf32, #tpu.memory_space<vmem>>, vector<1x8xf32>,
    %c7 = arith.constant 7 : index
    %c0_33 = arith.constant 0 : index
    %33 = tpu.strided_load %arg9[%c7, %c0_33] {strides = array<i32: 16, 1>} : memref<16x8xf32, #tpu.memory_space<vmem>>, vector<1x8xf32>
    %c0_34 = arith.constant 0 : index
    %c56 = arith.constant 56 : index
    %34 = vector.load %arg8[%c0_34, %c56] : memref<1x128xf32, #tpu.memory_space<vmem>>, vector<1x8xf32>
    tpu.vector_store %arg8[%c0_34, %c56], %33 {strides = array<i32>} : memref<1x128xf32, #tpu.memory_space<vmem>>, vector<1x8xf32>,
    %c8_35 = arith.constant 8 : index
    %c0_36 = arith.constant 0 : index
    %35 = tpu.strided_load %arg9[%c8_35, %c0_36] {strides = array<i32: 16, 1>} : memref<16x8xf32, #tpu.memory_space<vmem>>, vector<1x8xf32>
    %c0_37 = arith.constant 0 : index
    %c64 = arith.constant 64 : index
    %36 = vector.load %arg8[%c0_37, %c64] : memref<1x128xf32, #tpu.memory_space<vmem>>, vector<1x8xf32>
    tpu.vector_store %arg8[%c0_37, %c64], %35 {strides = array<i32>} : memref<1x128xf32, #tpu.memory_space<vmem>>, vector<1x8xf32>,
    %c9 = arith.constant 9 : index
    %c0_38 = arith.constant 0 : index
    %37 = tpu.strided_load %arg9[%c9, %c0_38] {strides = array<i32: 16, 1>} : memref<16x8xf32, #tpu.memory_space<vmem>>, vector<1x8xf32>
    %c0_39 = arith.constant 0 : index
    %c72 = arith.constant 72 : index
    %38 = vector.load %arg8[%c0_39, %c72] : memref<1x128xf32, #tpu.memory_space<vmem>>, vector<1x8xf32>
    tpu.vector_store %arg8[%c0_39, %c72], %37 {strides = array<i32>} : memref<1x128xf32, #tpu.memory_space<vmem>>, vector<1x8xf32>,
    %c10 = arith.constant 10 : index
    %c0_40 = arith.constant 0 : index
    %39 = tpu.strided_load %arg9[%c10, %c0_40] {strides = array<i32: 16, 1>} : memref<16x8xf32, #tpu.memory_space<vmem>>, vector<1x8xf32>
    %c0_41 = arith.constant 0 : index
    %c80 = arith.constant 80 : index
    %40 = vector.load %arg8[%c0_41, %c80] : memref<1x128xf32, #tpu.memory_space<vmem>>, vector<1x8xf32>
    tpu.vector_store %arg8[%c0_41, %c80], %39 {strides = array<i32>} : memref<1x128xf32, #tpu.memory_space<vmem>>, vector<1x8xf32>,
    %c11 = arith.constant 11 : index
    %c0_42 = arith.constant 0 : index
    %41 = tpu.strided_load %arg9[%c11, %c0_42] {strides = array<i32: 16, 1>} : memref<16x8xf32, #tpu.memory_space<vmem>>, vector<1x8xf32>
    %c0_43 = arith.constant 0 : index
    %c88 = arith.constant 88 : index
    %42 = vector.load %arg8[%c0_43, %c88] : memref<1x128xf32, #tpu.memory_space<vmem>>, vector<1x8xf32>
    tpu.vector_store %arg8[%c0_43, %c88], %41 {strides = array<i32>} : memref<1x128xf32, #tpu.memory_space<vmem>>, vector<1x8xf32>,
    %c12 = arith.constant 12 : index
    %c0_44 = arith.constant 0 : index
    %43 = tpu.strided_load %arg9[%c12, %c0_44] {strides = array<i32: 16, 1>} : memref<16x8xf32, #tpu.memory_space<vmem>>, vector<1x8xf32>
    %c0_45 = arith.constant 0 : index
    %c96 = arith.constant 96 : index
    %44 = vector.load %arg8[%c0_45, %c96] : memref<1x128xf32, #tpu.memory_space<vmem>>, vector<1x8xf32>
    tpu.vector_store %arg8[%c0_45, %c96], %43 {strides = array<i32>} : memref<1x128xf32, #tpu.memory_space<vmem>>, vector<1x8xf32>,
    %c13 = arith.constant 13 : index
    %c0_46 = arith.constant 0 : index
    %45 = tpu.strided_load %arg9[%c13, %c0_46] {strides = array<i32: 16, 1>} : memref<16x8xf32, #tpu.memory_space<vmem>>, vector<1x8xf32>
    %c0_47 = arith.constant 0 : index
    %c104 = arith.constant 104 : index
    %46 = vector.load %arg8[%c0_47, %c104] : memref<1x128xf32, #tpu.memory_space<vmem>>, vector<1x8xf32>
    tpu.vector_store %arg8[%c0_47, %c104], %45 {strides = array<i32>} : memref<1x128xf32, #tpu.memory_space<vmem>>, vector<1x8xf32>,
    %c14 = arith.constant 14 : index
    %c0_48 = arith.constant 0 : index
    %47 = tpu.strided_load %arg9[%c14, %c0_48] {strides = array<i32: 16, 1>} : memref<16x8xf32, #tpu.memory_space<vmem>>, vector<1x8xf32>
    %c0_49 = arith.constant 0 : index
    %c112 = arith.constant 112 : index
    %48 = vector.load %arg8[%c0_49, %c112] : memref<1x128xf32, #tpu.memory_space<vmem>>, vector<1x8xf32>
    tpu.vector_store %arg8[%c0_49, %c112], %47 {strides = array<i32>} : memref<1x128xf32, #tpu.memory_space<vmem>>, vector<1x8xf32>,
    %c15 = arith.constant 15 : index
    %c0_50 = arith.constant 0 : index
    %49 = tpu.strided_load %arg9[%c15, %c0_50] {strides = array<i32: 16, 1>} : memref<16x8xf32, #tpu.memory_space<vmem>>, vector<1x8xf32>
    %c0_51 = arith.constant 0 : index
    %c120 = arith.constant 120 : index
    %50 = vector.load %arg8[%c0_51, %c120] : memref<1x128xf32, #tpu.memory_space<vmem>>, vector<1x8xf32>
    tpu.vector_store %arg8[%c0_51, %c120], %49 {strides = array<i32>} : memref<1x128xf32, #tpu.memory_space<vmem>>, vector<1x8xf32>,
    return
  }
  func.func @transform_0(%arg0: i32) -> (i32, i32) {
    %c0_i32 = arith.constant 0 : i32
    %c0_i32_0 = arith.constant 0 : i32
    return %arg0, %c0_i32 : i32, i32
  }
  func.func @transform_1(%arg0: i32) -> (i32, i32) {
    %c0_i32 = arith.constant 0 : i32
    %c0_i32_0 = arith.constant 0 : i32
    %c0_i32_1 = arith.constant 0 : i32
    return %c0_i32, %c0_i32_0 : i32, i32
  }
  func.func @transform_2(%arg0: i32) -> (i32, i32) {
    %c0_i32 = arith.constant 0 : i32
    %c0_i32_0 = arith.constant 0 : i32
    %c0_i32_1 = arith.constant 0 : i32
    return %c0_i32, %c0_i32_0 : i32, i32
  }
  func.func @transform_3(%arg0: i32) -> (i32, i32) {
    %c0_i32 = arith.constant 0 : i32
    %c0_i32_0 = arith.constant 0 : i32
    %c0_i32_1 = arith.constant 0 : i32
    return %c0_i32, %c0_i32_0 : i32, i32
  }
  func.func @transform_4(%arg0: i32) -> (i32, i32) {
    %c0_i32 = arith.constant 0 : i32
    %c0_i32_0 = arith.constant 0 : i32
    %c0_i32_1 = arith.constant 0 : i32
    return %c0_i32, %c0_i32_0 : i32, i32
  }
  func.func @transform_5(%arg0: i32) -> (i32, i32) {
    %c0_i32 = arith.constant 0 : i32
    %c0_i32_0 = arith.constant 0 : i32
    %c0_i32_1 = arith.constant 0 : i32
    return %c0_i32, %c0_i32_0 : i32, i32
  }
  func.func @transform_6(%arg0: i32) -> (i32, i32) {
    %c0_i32 = arith.constant 0 : i32
    %c0_i32_0 = arith.constant 0 : i32
    %c0_i32_1 = arith.constant 0 : i32
    return %c0_i32, %c0_i32_0 : i32, i32
  }
  func.func @transform_7(%arg0: i32) -> (i32, i32) {
    %c0_i32 = arith.constant 0 : i32
    %c0_i32_0 = arith.constant 0 : i32
    return %arg0, %c0_i32 : i32, i32
  }
}

</mosaic_0001>

<bundles_post_ra>
// kernel: tpu_custom_call.1
= control target key start
LH: loop header
LB: loop body
LE: loop exit
PB: predicated region body
PF: predicated region fallthrough
CT: control target
= control target key end

     0   :  { %12 = vsyncpa [#allocation4], 0  ;;  %s823_s0 = inlined_call_operand.vmem [shape: f32[16,32], index: 0, kind: input, shape index: {}]   ;;  %s824_s1 = inlined_call_operand.hbm [shape: f32[32,64], index: 1, kind: input, shape index: {}]   ;;  %s825_s2 = inlined_call_operand.vmem [shape: f32[1,64], index: 2, kind: input, shape index: {}]   ;;  %s826_s3 = inlined_call_operand.vmem [shape: f32[64,64], index: 3, kind: input, shape index: {}]   ;;  %s827_s4 = inlined_call_operand.vmem [shape: f32[1,64], index: 4, kind: input, shape index: {}]   ;;  %s828_s5 = inlined_call_operand.vmem [shape: f32[64,8], index: 5, kind: input, shape index: {}]   ;;  %s829_s6 = inlined_call_operand.vmem [shape: f32[1,8], index: 6, kind: input, shape index: {}]   ;;  %s830_s7 = inlined_call_operand.hbm [shape: f32[1,128], index: 7, kind: output, shape index: {}]  }
   0x1   :  { %13 = vsyncpa [#allocation5], 0  ;;  %s672_s24 = smov [#allocation3]   ;;  %s624_s28 = scalar_lea.hbm %s824_s1, 512 }
   0x2   :  { %s21_s25 = sshll.u32 %s672_s24, 4  ;;  %p625_p0 = scmp.ne.s32.totalorder %s824_s1, %s624_s28  ;;  %s22_s25 = int_to_ptr.vmem [resolvable:$true] %s21_s25 }
   0x3   :  { %p628_p1 = scmp.lt.u32.totalorder %s624_s28, %s824_s1 }
   0x5   :  { %p630_p2 = pnand %p628_p1, %p625_p0 }
   0x7   :  { %633 = shalt.err (!%p630_p2)
}
   0x8   :  { %s634_s10 = scalar_lea.vmem %s22_s25, 512  ;;  %p639_p4 = scmp.lt.s32.totalorder %s22_s25, %s22_s25 }
   0x9   :  { %p635_p3 = scmp.ne.s32.totalorder %s22_s25, %s634_s10  ;;  %p640_p5 = scmp.lt.s32.totalorder %s634_s10, %s634_s10 }
   0xb   :  { %p641_p6 = por %p640_p5, %p639_p4 }
   0xd   :  { %p642_p7 = pnand %p641_p6, %p635_p3 }
   0xf   :  { %645 = shalt.err (!%p642_p7)
}
  0x10   :  { %s673_s11 = smov 128   ;;  %s674_s12 = smov 8  }
  0x11   :  { %27 = dma.hbm_to_vmem [thread:$0]  %s824_s1, 512, %s22_s25, [#allocation4], %s673_s11, %s673_s11, %s674_s12  }
  0x12   :  { %668 = dma.done.wait [#allocation4], 512  }
  0x13   :  { %669 = vsyncadd [#allocation4], 4294966784  ;;  %vm54_vm0 = vcmask 261120   ;;  %v43_v0 = vld [vmem:[#allocation3] sm:$0xff]  ;;  %v44_v1 = vld [vmem:[#allocation3 + $0x8] sm:$0xff]  ;;  %vm153_vm1 = vcmask 523264  }
  0x14   :  { %v45_v2 = vld [vmem:[#allocation3 + $0x10] sm:$0xff]  ;;  %v558_v3 = vpack.c.bf16 %v44_v1, %v43_v0  ;;  %v46_v4 = vld [vmem:[#allocation3 + $0x18] sm:$0xff]  ;;  %v140_v11 = vld [vmem:[%s826_s3 + $0x10] sm:$0xff]  ;;  %vm333_vm2 = vcmask 64512   ;;  %s676_s28 = smov 64   ;;  %s677_s29 = smov 88  }
  0x15   :  { %v41_v5 = vld [vmem:[%s823_s0] sm:$0xff]  ;;  %v562_v6 = vpack.c.bf16 %v46_v4, %v45_v2  ;;  %v42_v7 = vld [vmem:[%s823_s0 + $0x8] sm:$0xff]  ;;  %v141_v12 = vld [vmem:[%s826_s3 + $0x18] sm:$0xff]  ;;  %s678_s30 = smov 80   ;;  %vm337_vm3 = vcmask 57344   ;;  %s680_s8 = smov 32  }
  0x16   :  { %517 = vmatprep.mubr.msk.f32.mxu0 %vm54_vm0, %v41_v5  ;;  %559 = vmatprep.subr.bf16.mxu0 %v558_v3  ;;  %v138_v8 = vld [vmem:[%s826_s3] sm:$0xff]  ;;  %v139_v9 = vld [vmem:[%s826_s3 + $0x8] sm:$0xff]  ;;  %v570_v13 = vpack.c.bf16 %v141_v12, %v140_v11  ;;  %v144_v16 = vld [vmem:[%s826_s3 + $0x30] sm:$0xff]  ;;  %s681_s9 = smov 16   ;;  %s682_s10 = smov 48   ;;  %vm345_vm4 = vcmask 122944  }
  0x17   :  { %561 = vmatpush3.bf16.msra.mxu0 %v558_v3  ;;  %v566_v10 = vpack.c.bf16 %v139_v9, %v138_v8  ;;  %v142_v14 = vld [vmem:[%s826_s3 + $0x20] sm:$0xff]  ;;  %v143_v15 = vld [vmem:[%s826_s3 + $0x28] sm:$0xff]  ;;  %v145_v18 = vld [vmem:[%s826_s3 + $0x38] sm:$0xff]  ;;  %s683_s11 = smov 40   ;;  %s684_s3 = smov 96   ;;  %vm353_vm5 = vcmask 188544  }
  0x18   :  { %563 = vmatprep.subr.bf16.mxu0 %v562_v6  ;;  %v574_v17 = vpack.c.bf16 %v143_v15, %v142_v14  ;;  %v578_v19 = vpack.c.bf16 %v145_v18, %v144_v16  ;;  %v474_v20 = vld [vmem:[%s825_s2] ss:$0 sm:$0xff]  ;;  %v238_v28 = vld [vmem:[%s828_s5 + $0x8] sm:$0xff]  ;;  %v239_v30 = vld [vmem:[%s828_s5 + $0x10] sm:$0xff]  ;;  %s685_s13 = smov 56   ;;  %s687_s14 = smov 104  }
  0x19   :  { %567 = vmatprep.subr.bf16.mxu1 %v566_v10  ;;  %v237_v27 = vld [vmem:[%s828_s5] sm:$0xff]  ;;  %v240_v31 = vld [vmem:[%s828_s5 + $0x18] sm:$0xff]  ;;  %v242_v34 = vld [vmem:[%s828_s5 + $0x28] sm:$0xff]  ;;  %s688_s15 = smov 120   ;;  %vm361_vm6 = vcmask 254144   ;;  %vm369_vm7 = vcmask 319744  }
  0x1a   :  { %569 = vmatpush3.bf16.msra.mxu1 %v566_v10  ;;  %v582_v29 = vpack.c.bf16 %v238_v28, %v237_v27  ;;  %v586_v32 = vpack.c.bf16 %v240_v31, %v239_v30  ;;  %v241_v33 = vld [vmem:[%s828_s5 + $0x20] sm:$0xff]  ;;  %v243_v35 = vld [vmem:[%s828_s5 + $0x30] sm:$0xff]  ;;  %v244_v37 = vld [vmem:[%s828_s5 + $0x38] sm:$0xff]  ;;  %vm377_vm8 = vcmask 385344   ;;  %vm385_vm9 = vcmask 450944   ;;  %s689_s2 = smov [#allocation6]  }
  0x1b   :  { %565 = vmatpush3.bf16.msra.mxu0 %v562_v6  ;;  %571 = vmatprep.subr.bf16.mxu1 %v570_v13  ;;  %v590_v36 = vpack.c.bf16 %v242_v34, %v241_v33  ;;  %v594_v38 = vpack.c.bf16 %v244_v37, %v243_v35  ;;  %v477_v39 = vld [vmem:[%s827_s4] ss:$0 sm:$0xff]  ;;  %s675_s4 = smov 72   ;;  %vm393_vm10 = vcmask 516544   ;;  %vm401_vm11 = vcmask 582144   ;;  %s465_s16 = sshll.u32 %s689_s2, 4  ;;  %s466_s16 = int_to_ptr.vmem [resolvable:$true] %s465_s16 }
  0x1c   :  { %583 = vmatprep.subr.bf16.mxu0 %v582_v29  ;;  %v480_v46 = vld [vmem:[%s829_s6] ss:$0 sm:$0xff]  ;;  %s679_s6 = smov 24   ;;  %vm409_vm12 = vcmask 647744   ;;  %vm417_vm13 = vcmask 713344   ;;  %vm425_vm14 = vcmask 778944   ;;  %p651_p9 = scmp.lt.s32.totalorder %s466_s16, %s466_s16 }
  0x1d   :  { %vm433_vm15 = vcmask 844544   ;;  %s646_s17 = scalar_lea.vmem %s466_s16, 16  ;;  %s650_s1 = scalar_lea.vmem %s466_s16, 32 }
  0x1e   :  { %518 = vmatmul.mubr.msk.f32.vlgmr.msra.gmra.mrb[0].mxu0 %vm54_vm0, %v42_v7  ;;  %573 = vmatpush3.bf16.msra.mxu1 %v570_v13  ;;  %vm441_vm0 = vcmask 910144   ;;  %p647_p8 = scmp.ne.s32.totalorder %s466_s16, %s646_s17  ;;  %p652_p10 = scmp.lt.s32.totalorder %s650_s1, %s646_s17 }
  0x1f   :  { %575 = vmatprep.subr.bf16.mxu1 %v574_v17  ;;  %585 = vmatpush3.bf16.msra.mxu0 %v582_v29 }
  0x20   :  { %587 = vmatprep.subr.bf16.mxu0 %v586_v32  ;;  %p653_p11 = por %p652_p10, %p651_p9 }
  0x22   :  { %577 = vmatpush3.bf16.msra.mxu1 %v574_v17  ;;  %p654_p12 = pnand %p653_p11, %p647_p8 }
  0x23   :  { %579 = vmatprep.subr.bf16.mxu1 %v578_v19  ;;  %589 = vmatpush3.bf16.msra.mxu0 %v586_v32 }
  0x24   :  { %591 = vmatprep.subr.bf16.mxu0 %v590_v36 }
  0x26   :  { %581 = vmatpush3.bf16.msra.mxu1 %v578_v19 }
  0x27   :  { %593 = vmatpush3.bf16.msra.mxu0 %v590_v36 }
  0x28   :  { %595 = vmatprep.subr.bf16.mxu0 %v594_v38 }
  0x2b   :  { %597 = vmatpush3.bf16.msra.mxu0 %v594_v38 }
  0xf1   :  { %v519_v21 = vpop.f32.mrb[0].mxu0 }
  0xf2   :  { %v133_v22 = vadd.f32 %v519_v21, %v474_v20  ;;  %v127_v23 = vpop.f32.mrb[1].mxu0 }
  0xf3   :  { %v128_v24 = vadd.f32 %v474_v20, %v127_v23 }
  0xf5   :  { %616 = vtanh.f32 %v128_v24 }
  0xf6   :  { %618 = vtanh.f32 %v133_v22 }
  0xff   :  { %v617_v25 = vpop.eup %616 }
 0x100   :  { %v619_v26 = vpop.eup %618  ;;  %536 = vmatprep.mubr.msk.f32.mxu1 %vm153_vm1, %v617_v25 }
 0x101   :  { %537 = vmatmul.mubr.msk.f32.vlgmr.msra.gmra.mrb[0].mxu1 %vm153_vm1, %v619_v26 }
 0x1d4   :  { %v538_v40 = vpop.f32.mrb[0].mxu1 }
 0x1d5   :  { %v232_v41 = vadd.f32 %v538_v40, %v477_v39  ;;  %v226_v42 = vpop.f32.mrb[1].mxu1 }
 0x1d6   :  { %v227_v43 = vadd.f32 %v477_v39, %v226_v42 }
 0x1d8   :  { %620 = vtanh.f32 %v227_v43 }
 0x1d9   :  { %622 = vtanh.f32 %v232_v41 }
 0x1e2   :  { %v621_v44 = vpop.eup %620 }
 0x1e3   :  { %v623_v45 = vpop.eup %622  ;;  %555 = vmatprep.mubr.msk.f32.mxu0 %vm153_vm1, %v621_v44 }
 0x1e4   :  { %556 = vmatmul.mubr.msk.f32.vlgmr.msra.gmra.mrb[2].mxu0 %vm153_vm1, %v623_v45  ;;  %vm449_vm1 = vcmask 975744  }
 0x2b7   :  { %v557_v47 = vpop.f32.mrb[2].mxu0 }
 0x2b8   :  { %v330_v48 = vadd.f32 %v557_v47, %v480_v46  ;;  %v324_v49 = vpop.f32.mrb[3].mxu0 }
 0x2b9   :  { %v325_v50 = vadd.f32 %v480_v46, %v324_v49 }
 0x2ba   :  { %335 = vst.msk [vmem:[#allocation2 + $0x8] sm:$0xff] %vm333_vm2, %v330_v48 }
 0x2bb   :  { %334 = vst.msk [vmem:[#allocation2] sm:$0xff] %vm333_vm2, %v325_v50  ;;  %vm457_vm2 = vcmask 1041344  }
 0x2c1   :  { %v404_v51 = vld [vmem:[#allocation2 + $0x9] ss:$16 sm:$0x1]  ;;  %v396_v52 = vld [vmem:[#allocation2 + $0x8] ss:$16 sm:$0x1] }
 0x2c2   :  { %406 = vrot.lane.b32.xlu0 %v404_v51, %s675_s4  ;;  %398 = vrot.lane.b32.xlu1 %v396_v52, %s676_s28  ;;  %v420_v53 = vld [vmem:[#allocation2 + $0xb] ss:$16 sm:$0x1]  ;;  %v412_v54 = vld [vmem:[#allocation2 + $0xa] ss:$16 sm:$0x1] }
 0x2c3   :  { %v336_v55 = vld [vmem:[#allocation2] ss:$16 sm:$0x1]  ;;  %v356_v56 = vld [vmem:[#allocation2 + $0x3] ss:$16 sm:$0x1] }
 0x2c4   :  { %v340_v57 = vld [vmem:[#allocation2 + $0x1] ss:$16 sm:$0x1]  ;;  %338 = vst.msk [vmem:[#allocation6] sm:$0x1] %vm337_vm3, %v336_v55 }
 0x2c5   :  { %v364_v58 = vld [vmem:[#allocation2 + $0x4] ss:$16 sm:$0x1]  ;;  %v348_v59 = vld [vmem:[#allocation2 + $0x2] ss:$16 sm:$0x1] }
 0x2c6   :  { %422 = vrot.lane.b32.xlu0 %v420_v53, %s677_s29  ;;  %414 = vrot.lane.b32.xlu1 %v412_v54, %s678_s30  ;;  %v380_v60 = vld [vmem:[#allocation2 + $0x6] ss:$16 sm:$0x1]  ;;  %v372_v61 = vld [vmem:[#allocation2 + $0x5] ss:$16 sm:$0x1] }
 0x2c7   :  { %v428_v62 = vld [vmem:[#allocation2 + $0xc] ss:$16 sm:$0x1]  ;;  %v388_v63 = vld [vmem:[#allocation2 + $0x7] ss:$16 sm:$0x1] }
 0x2c8   :  { %v444_v0 = vld [vmem:[#allocation2 + $0xe] ss:$16 sm:$0x1]  ;;  %v436_v1 = vld [vmem:[#allocation2 + $0xd] ss:$16 sm:$0x1] }
 0x2c9   :  { %v452_v2 = vld [vmem:[#allocation2 + $0xf] ss:$16 sm:$0x1] }
 0x2ca   :  { %358 = vrot.lane.b32.xlu1 %v356_v56, %s679_s6  ;;  %342 = vrot.lane.b32.xlu0 %v340_v57, %s674_s12  ;;  %s686_s12 = smov 112  }
 0x2ce   :  { %366 = vrot.lane.b32.xlu1 %v364_v58, %s680_s8  ;;  %350 = vrot.lane.b32.xlu0 %v348_v59, %s681_s9 }
 0x2d2   :  { %382 = vrot.lane.b32.xlu1 %v380_v60, %s682_s10  ;;  %374 = vrot.lane.b32.xlu0 %v372_v61, %s683_s11 }
 0x2d6   :  { %430 = vrot.lane.b32.xlu1 %v428_v62, %s684_s3  ;;  %390 = vrot.lane.b32.xlu0 %v388_v63, %s685_s13 }
 0x2da   :  { %446 = vrot.lane.b32.xlu1 %v444_v0, %s686_s12  ;;  %438 = vrot.lane.b32.xlu0 %v436_v1, %s687_s14 }
 0x2de   :  { %454 = vrot.lane.b32.xlu0 %v452_v2, %s688_s15 }
 0x334   :  { %v407_v3 = vpop.permute.xlu0 %406  ;;  %v399_v4 = vpop.permute.xlu1 %398 }
 0x338   :  { %v423_v5 = vpop.permute.xlu0 %422  ;;  %v415_v6 = vpop.permute.xlu1 %414 }
 0x33c   :  { %v359_v7 = vpop.permute.xlu1 %358  ;;  %v343_v8 = vpop.permute.xlu0 %342 }
 0x33d   :  { %346 = vst.msk [vmem:[#allocation6] sm:$0x1] %vm345_vm4, %v343_v8 }
 0x340   :  { %v367_v9 = vpop.permute.xlu1 %366  ;;  %v351_v10 = vpop.permute.xlu0 %350 }
 0x341   :  { %354 = vst.msk [vmem:[#allocation6] sm:$0x1] %vm353_vm5, %v351_v10 }
 0x342   :  { %362 = vst.msk [vmem:[#allocation6] sm:$0x1] %vm361_vm6, %v359_v7 }
 0x343   :  { %370 = vst.msk [vmem:[#allocation6] sm:$0x1] %vm369_vm7, %v367_v9 }
 0x344   :  { %v383_v11 = vpop.permute.xlu1 %382  ;;  %v375_v12 = vpop.permute.xlu0 %374 }
 0x345   :  { %378 = vst.msk [vmem:[#allocation6] sm:$0x1] %vm377_vm8, %v375_v12 }
 0x346   :  { %386 = vst.msk [vmem:[#allocation6] sm:$0x1] %vm385_vm9, %v383_v11 }
 0x348   :  { %v391_v13 = vpop.permute.xlu0 %390  ;;  %v431_v14 = vpop.permute.xlu1 %430 }
 0x349   :  { %394 = vst.msk [vmem:[#allocation6] sm:$0x1] %vm393_vm10, %v391_v13 }
 0x34a   :  { %402 = vst.msk [vmem:[#allocation6] sm:$0x1] %vm401_vm11, %v399_v4 }
 0x34b   :  { %410 = vst.msk [vmem:[#allocation6] sm:$0x1] %vm409_vm12, %v407_v3 }
 0x34c   :  { %v439_v15 = vpop.permute.xlu0 %438  ;;  %418 = vst.msk [vmem:[#allocation6] sm:$0x1] %vm417_vm13, %v415_v6  ;;  %v447_v16 = vpop.permute.xlu1 %446 }
 0x34d   :  { %426 = vst.msk [vmem:[#allocation6] sm:$0x1] %vm425_vm14, %v423_v5 }
 0x34e   :  { %434 = vst.msk [vmem:[#allocation6] sm:$0x1] %vm433_vm15, %v431_v14 }
 0x34f   :  { %442 = vst.msk [vmem:[#allocation6] sm:$0x1] %vm441_vm0, %v439_v15 }
 0x350   :  { %v455_v17 = vpop.permute.xlu0 %454  ;;  %450 = vst.msk [vmem:[#allocation6] sm:$0x1] %vm449_vm1, %v447_v16 }
 0x351   :  { %458 = vst.msk [vmem:[#allocation6] sm:$0x1] %vm457_vm2, %v455_v17 }
 0x352   :  { %657 = shalt.err (!%p654_p12)
}
 0x353   :  { %s658_s20 = scalar_lea.hbm %s830_s7, 16 }
 0x354   :  { %p659_p13 = scmp.ne.s32.totalorder %s830_s7, %s658_s20  ;;  %p662_p0 = scmp.lt.u32.totalorder %s658_s20, %s830_s7 }
 0x356   :  { %p664_p1 = pnand %p662_p0, %p659_p13 }
 0x358   :  { %667 = shalt.err (!%p664_p1)
}
 0x359   :  { %468 = dma.vmem_to_hbm [thread:$0]  %s466_s16, 16, %s830_s7, [#allocation5]  }
 0x35a   :  { %670 = dma.done.wait [#allocation5], 16  }
 0x35b   :  { %671 = vsyncadd [#allocation5], 4294967280 }
 0x35c   :  { %472 = vsyncpa [#allocation4], 1 }
 0x35d   :  { %473 = vsyncpa [#allocation5], 1 }

</bundles_post_ra>
